<compile_context>
chip_gen: v7x
topology: tpu7x:2x2x1
jax: 0.10.0
libtpu: 0.0.40
codegen_flags: <defaults>
</compile_context>

<pallas_src>
import functools

import jax
import jax.numpy as jnp
from jax.experimental import pallas as pl
from jax.experimental.pallas import tpu as pltpu


def _mlp_head_kernel(x_ref, w1_ref, b1_ref, w2_ref, b2_ref, o_ref):
    # In-kernel f32 -> bf16 cast (VPU, hidden under the DMA); MXU accumulates f32.
    x = x_ref[...].astype(jnp.bfloat16)                         # (TB, 512)
    h = jnp.dot(x, w1_ref[...], preferred_element_type=jnp.float32)
    h = jnp.maximum(h + b1_ref[...], 0.0)                       # bias + ReLU (f32, VPU)
    # Dropout(p=0.5) is identity in eval/inference mode.
    # Layer 2 (out_features = 1): VPU multiply + lane (XLU) reduction instead
    # of an N=1 MXU matmul. w2_ref is (1, 256) f32, broadcast over rows.
    logits = jnp.sum(h * w2_ref[...], axis=-1, keepdims=True)   # (TB, 1) f32
    logits = logits + b2_ref[0, 0]                              # scalar bias from SMEM
    o_ref[...] = jax.nn.sigmoid(logits).astype(o_ref.dtype)


def _round8(n):
    return ((n + 7) // 8) * 8


@functools.partial(jax.jit, static_argnames=("block_b",))
def clip_binary_classifier_forward(x, w1, b1, w2, b2, *, block_b=4096):
    """Forward pass: sigmoid(relu(x @ w1 + b1) @ w2 + b2).

    x:  (B, 512)   image features (native dtype; cast to bf16 inside the kernel)
    w1: (512, 256) first linear weight, stored (in, out)
    b1: (1, 256)
    w2: (256, 1)   second linear weight, stored (in, out)
    b2: (1, 1)
    Returns (B, 1) float32 probabilities.
    """
    B, D_in = x.shape
    D_hid = w1.shape[1]

    # Batch tile: big tiles amortize per-step overhead; for small/medium B keep
    # >= 2 tiles (when B >= 16) so v7x's two TensorCores both get work.
    if B <= block_b:
        if B >= 16:
            tb = _round8(-(-B // 2))     # ceil(B/2), rounded up to sublane multiple
        else:
            tb = _round8(B)
    else:
        tb = block_b
    num_tiles = pl.cdiv(B, tb)           # partial trailing block handled by Pallas

    # VMEM budget: x f32 double-buffered (tb*4 KiB) dominates; add room for the
    # bf16 copy, f32 hidden activations and resident weights. Cap at v7x's 64 MiB.
    vmem_limit = min(64 << 20, max(16 << 20, tb * 12 * 1024 + (2 << 20)))

    # Weights: W1 in bf16 for the MXU (tiny one-off cast); biases / layer-2 row f32.
    w1_bf16 = w1.astype(jnp.bfloat16)
    b1_f32 = b1.reshape(1, D_hid).astype(jnp.float32)
    w2_row = w2.reshape(1, D_hid).astype(jnp.float32)    # (1, 256) row vector
    b2_s = b2.reshape(1, 1).astype(jnp.float32)          # SMEM scalar

    out_shape = jax.ShapeDtypeStruct((B, 1), jnp.float32)

    cost = pl.CostEstimate(
        flops=2 * B * D_in * D_hid + 2 * B * D_hid,
        transcendentals=B,                                # sigmoid
        bytes_accessed=(B * D_in * x.dtype.itemsize       # x read in native dtype
                        + D_in * D_hid * 2                # W1 bf16
                        + D_hid * 4 * 2 + 4               # b1, w2, b2
                        + B * 4),                         # output
    )

    out = pl.pallas_call(
        _mlp_head_kernel,
        out_shape=out_shape,
        grid=(num_tiles,),
        in_specs=[
            pl.BlockSpec((tb, D_in), lambda i: (i, 0)),          # x tile (native dtype)
            pl.BlockSpec((D_in, D_hid), lambda i: (0, 0)),       # W1 (resident)
            pl.BlockSpec((1, D_hid), lambda i: (0, 0)),          # b1 (resident)
            pl.BlockSpec((1, D_hid), lambda i: (0, 0)),          # w2 row (resident)
            pl.BlockSpec(memory_space=pltpu.MemorySpace.SMEM),   # b2 scalar
        ],
        out_specs=pl.BlockSpec((tb, 1), lambda i: (i, 0)),
        compiler_params=pltpu.CompilerParams(
            dimension_semantics=("parallel",),
            vmem_limit_bytes=vmem_limit,
        ),
        cost_estimate=cost,
    )(x, w1_bf16, b1_f32, w2_row, b2_s)

    return out


def init_params(key):
    """kaiming_normal_(mode='fan_out', nonlinearity='relu'), zero biases —
    matching the PyTorch module's __init__."""
    k1, k2 = jax.random.split(key, 2)
    # Linear(512, 256): weight (256, 512); fan_out=256; std = sqrt(2/256).
    std1 = jnp.sqrt(2.0 / 256.0)
    w1 = (jax.random.normal(k1, (256, 512), dtype=jnp.float32) * std1).T  # (512, 256)
    b1 = jnp.zeros((1, 256), dtype=jnp.float32)
    # Linear(256, 1): weight (1, 256); fan_out=1; std = sqrt(2/1).
    std2 = jnp.sqrt(2.0 / 1.0)
    w2 = (jax.random.normal(k2, (1, 256), dtype=jnp.float32) * std2).T    # (256, 1)
    b2 = jnp.zeros((1, 1), dtype=jnp.float32)
    return w1, b1, w2, b2


def reference_forward_f32(x, w1, b1, w2, b2):
    h = jnp.maximum(x @ w1 + b1, 0.0)
    return jax.nn.sigmoid(h @ w2 + b2)


def reference_forward_bf16(x, w1, b1, w2, b2):
    """Same bf16-input / f32-accumulate recipe as the kernel."""
    h = jnp.dot(x.astype(jnp.bfloat16), w1.astype(jnp.bfloat16),
                preferred_element_type=jnp.float32)
    h = jnp.maximum(h + b1, 0.0)
    return jax.nn.sigmoid(h @ w2 + b2)


if __name__ == "__main__":
    key = jax.random.PRNGKey(0)
    k_params, k_x1, k_x2 = jax.random.split(key, 3)

    w1, b1, w2, b2 = init_params(k_params)

    # Small batch of CLIP-style normalized 512-d image features.
    batch = 8
    x = jax.random.normal(k_x1, (batch, 512), dtype=jnp.float32)
    x = x / jnp.linalg.norm(x, axis=-1, keepdims=True)

    out = clip_binary_classifier_forward(x, w1, b1, w2, b2)
    out = jax.block_until_ready(out)

    ref_bf16 = reference_forward_bf16(x, w1, b1, w2, b2)
    ref_f32 = reference_forward_f32(x, w1, b1, w2, b2)
    assert out.shape == (batch, 1), out.shape
    assert jnp.allclose(out, ref_bf16, atol=1e-4, rtol=1e-4), (out, ref_bf16)
    assert jnp.allclose(out, ref_f32, atol=1e-2, rtol=1e-2), (out, ref_f32)
    assert bool(jnp.all((out >= 0.0) & (out <= 1.0)))

    # Exercise the ragged-batch path (B not a multiple of the tile): 2 tiles of
    # 16 rows, second one partial with masked output stores — no HBM pad pass.
    batch2 = 19
    x2 = jax.random.normal(k_x2, (batch2, 512), dtype=jnp.float32)
    x2 = x2 / jnp.linalg.norm(x2, axis=-1, keepdims=True)
    out2 = jax.block_until_ready(
        clip_binary_classifier_forward(x2, w1, b1, w2, b2))
    ref2 = reference_forward_bf16(x2, w1, b1, w2, b2)
    assert out2.shape == (batch2, 1), out2.shape
    assert jnp.allclose(out2, ref2, atol=1e-4, rtol=1e-4), (out2, ref2)

    print("KERNEL_OK")
</pallas_src>

<mosaic_0001>
module attributes {stable_mosaic.version = 11 : i64} {
  func.func @_mlp_head_kernel(%arg0: i32, %arg1: memref<8x512xf32, #tpu.memory_space<vmem>>, %arg2: memref<512x256xbf16, #tpu.memory_space<vmem>>, %arg3: memref<1x256xf32, #tpu.memory_space<vmem>>, %arg4: memref<1x256xf32, #tpu.memory_space<vmem>>, %arg5: memref<1x1xf32, #tpu.memory_space<smem>>, %arg6: memref<8x1xf32, #tpu.memory_space<vmem>>) attributes {dimension_semantics = [#tpu.dimension_semantics<parallel>], iteration_bounds = array<i64: 1>, scalar_prefetch = 0 : i64, scratch_operands = 0 : i64, tpu.core_type = #tpu.core_type<tc>, window_params = [{transform_indices = @transform_0, window_bounds = array<i64: 8, 512>}, {pipeline_mode = #tpu.pipeline_mode<synchronous>, transform_indices = @transform_1, window_bounds = array<i64: 512, 256>}, {pipeline_mode = #tpu.pipeline_mode<synchronous>, transform_indices = @transform_2, window_bounds = array<i64: 1, 256>}, {pipeline_mode = #tpu.pipeline_mode<synchronous>, transform_indices = @transform_3, window_bounds = array<i64: 1, 256>}, {transform_indices = @transform_4, window_bounds = array<i64: 1, 1>}, {transform_indices = @transform_5, window_bounds = array<i64: 8, 1>}]} {
    %c0 = arith.constant 0 : index
    %c0_0 = arith.constant 0 : index
    %0 = vector.load %arg1[%c0, %c0_0] : memref<8x512xf32, #tpu.memory_space<vmem>>, vector<8x512xf32>
    %1 = arith.truncf %0 : vector<8x512xf32> to vector<8x512xbf16>
    %c0_1 = arith.constant 0 : index
    %c0_2 = arith.constant 0 : index
    %2 = vector.load %arg2[%c0_1, %c0_2] : memref<512x256xbf16, #tpu.memory_space<vmem>>, vector<512x256xbf16>
    %cst = arith.constant dense<0.000000e+00> : vector<8x256xf32>
    %3 = tpu.matmul %1, %2, %cst {dimension_numbers = #tpu.dot_dimension_numbers<[1], [0], [0], [1], [0, 0, 1, 1], [], []>} : vector<8x512xbf16>, vector<512x256xbf16>, vector<8x256xf32> -> vector<8x256xf32>
    %c0_3 = arith.constant 0 : index
    %c0_4 = arith.constant 0 : index
    %4 = vector.load %arg3[%c0_3, %c0_4] : memref<1x256xf32, #tpu.memory_space<vmem>>, vector<1x256xf32>
    %5 = vector.broadcast %4 : vector<1x256xf32> to vector<8x256xf32>
    %6 = arith.addf %3, %5 : vector<8x256xf32>
    %cst_5 = arith.constant 0.000000e+00 : f32
    %7 = vector.broadcast %cst_5 : f32 to vector<8x256xf32>
    %8 = arith.maximumf %6, %7 : vector<8x256xf32>
    %c0_6 = arith.constant 0 : index
    %c0_7 = arith.constant 0 : index
    %9 = vector.load %arg4[%c0_6, %c0_7] : memref<1x256xf32, #tpu.memory_space<vmem>>, vector<1x256xf32>
    %10 = vector.broadcast %9 : vector<1x256xf32> to vector<8x256xf32>
    %11 = arith.mulf %8, %10 : vector<8x256xf32>
    %cst_8 = arith.constant dense<0.000000e+00> : vector<8xf32>
    %12 = vector.multi_reduction <add>, %11, %cst_8 [1] : vector<8x256xf32> to vector<8xf32>
    %13 = vector.shape_cast %12 : vector<8xf32> to vector<8x1xf32>
    %c0_9 = arith.constant 0 : index
    %c0_10 = arith.constant 0 : index
    %14 = memref.load %arg5[%c0_9, %c0_10] : memref<1x1xf32, #tpu.memory_space<smem>>
    %15 = vector.broadcast %14 : f32 to vector<8x1xf32>
    %16 = arith.addf %13, %15 : vector<8x1xf32>
    %17 = arith.negf %16 : vector<8x1xf32>
    %18 = math.exp %17 : vector<8x1xf32>
    %cst_11 = arith.constant 1.000000e+00 : f32
    %19 = vector.broadcast %cst_11 : f32 to vector<8x1xf32>
    %20 = arith.addf %19, %18 : vector<8x1xf32>
    %21 = arith.divf %19, %20 : vector<8x1xf32>
    %c0_12 = arith.constant 0 : index
    %c0_13 = arith.constant 0 : index
    %22 = vector.load %arg6[%c0_12, %c0_13] : memref<8x1xf32, #tpu.memory_space<vmem>>, vector<8x1xf32>
    tpu.vector_store %arg6[%c0_12, %c0_13], %21 {strides = array<i32>} : memref<8x1xf32, #tpu.memory_space<vmem>>, vector<8x1xf32>,
    return
  }
  func.func @transform_0(%arg0: i32) -> (i32, i32) {
    %c0_i32 = arith.constant 0 : i32
    %c0_i32_0 = arith.constant 0 : i32
    return %arg0, %c0_i32 : i32, i32
  }
  func.func @transform_1(%arg0: i32) -> (i32, i32) {
    %c0_i32 = arith.constant 0 : i32
    %c0_i32_0 = arith.constant 0 : i32
    %c0_i32_1 = arith.constant 0 : i32
    return %c0_i32, %c0_i32_0 : i32, i32
  }
  func.func @transform_2(%arg0: i32) -> (i32, i32) {
    %c0_i32 = arith.constant 0 : i32
    %c0_i32_0 = arith.constant 0 : i32
    %c0_i32_1 = arith.constant 0 : i32
    return %c0_i32, %c0_i32_0 : i32, i32
  }
  func.func @transform_3(%arg0: i32) -> (i32, i32) {
    %c0_i32 = arith.constant 0 : i32
    %c0_i32_0 = arith.constant 0 : i32
    %c0_i32_1 = arith.constant 0 : i32
    return %c0_i32, %c0_i32_0 : i32, i32
  }
  func.func @transform_4(%arg0: i32) -> (i32, i32) {
    %c0_i32 = arith.constant 0 : i32
    %c0_i32_0 = arith.constant 0 : i32
    %c0_i32_1 = arith.constant 0 : i32
    return %c0_i32, %c0_i32_0 : i32, i32
  }
  func.func @transform_5(%arg0: i32) -> (i32, i32) {
    %c0_i32 = arith.constant 0 : i32
    %c0_i32_0 = arith.constant 0 : i32
    return %arg0, %c0_i32 : i32, i32
  }
}

</mosaic_0001>

<bundles_post_ra>
// kernel: clip_binary_classifier_forward.1
= control target key start
LH: loop header
LB: loop body
LE: loop exit
PB: predicated region body
PF: predicated region fallthrough
CT: control target
= control target key end

     0   :  { %vm535_vm0 = vcmask 7168   ;;  %s956_s1 = inlined_call_operand.vmem [shape: bf16[512,256], index: 1, kind: input, shape index: {}]   ;;  %s957_s0 = inlined_call_operand.vmem [shape: f32[8,512], index: 0, kind: input, shape index: {}]   ;;  %s958_s2 = inlined_call_operand.vmem [shape: f32[1,256], index: 2, kind: input, shape index: {}]   ;;  %s959_s3 = inlined_call_operand.vmem [shape: f32[1,256], index: 3, kind: input, shape index: {}]   ;;  %s960_s4 = inlined_call_operand.<no memory space> [shape: f32[1,1], index: 4, kind: input, shape index: {}]   ;;  %s961_s5 = inlined_call_operand.vmem [shape: f32[8,1], index: 5, kind: output, shape index: {}]  }
   0x1   :  { %v610_v0 = vld [vmem:[%s956_s1 + $0x4] ss:$8 sps:$4 sm:$0xff]   ;;  %v614_v2 = vld [vmem:[%s956_s1] ss:$8 sps:$4 sm:$0xff]   ;;  %v616_v4 = vld [vmem:[%s956_s1 + $0x14] ss:$8 sps:$4 sm:$0xff]  }
   0x2   :  { %v612_v1 = vld [vmem:[%s956_s1 + $0x104] ss:$8 sps:$4 sm:$0xff]   ;;  %425 = vmatprep.subr.bf16.mxu1 %v610_v0  ;;  %v615_v3 = vld [vmem:[%s956_s1 + $0x100] ss:$8 sps:$4 sm:$0xff]   ;;  %v618_v5 = vld [vmem:[%s956_s1 + $0x114] ss:$8 sps:$4 sm:$0xff]  }
   0x3   :  { %466 = vmatprep.subr.bf16.mxu0 %v612_v1  ;;  %426 = vmatpush1.bf16.msra.mxu1 %v614_v2  ;;  %v620_v6 = vld [vmem:[%s956_s1 + $0x10] ss:$8 sps:$4 sm:$0xff]   ;;  %v622_v8 = vld [vmem:[%s956_s1 + $0x24] ss:$8 sps:$4 sm:$0xff]   ;;  %v626_v10 = vld [vmem:[%s956_s1 + $0x20] ss:$8 sps:$4 sm:$0xff]  }
   0x4   :  { %467 = vmatpush1.bf16.msra.mxu0 %v615_v3  ;;  %427 = vmatprep.subr.bf16.mxu1 %v616_v4  ;;  %v621_v7 = vld [vmem:[%s956_s1 + $0x110] ss:$8 sps:$4 sm:$0xff]   ;;  %v624_v9 = vld [vmem:[%s956_s1 + $0x124] ss:$8 sps:$4 sm:$0xff]   ;;  %v627_v11 = vld [vmem:[%s956_s1 + $0x120] ss:$8 sps:$4 sm:$0xff]  }
   0x5   :  { %468 = vmatprep.subr.bf16.mxu0 %v618_v5  ;;  %v628_v12 = vld [vmem:[%s956_s1 + $0x34] ss:$8 sps:$4 sm:$0xff]   ;;  %v632_v14 = vld [vmem:[%s956_s1 + $0x30] ss:$8 sps:$4 sm:$0xff]   ;;  %v634_v16 = vld [vmem:[%s956_s1 + $0x44] ss:$8 sps:$4 sm:$0xff]  }
   0x6   :  { %v630_v13 = vld [vmem:[%s956_s1 + $0x134] ss:$8 sps:$4 sm:$0xff]   ;;  %v633_v15 = vld [vmem:[%s956_s1 + $0x130] ss:$8 sps:$4 sm:$0xff]   ;;  %v636_v17 = vld [vmem:[%s956_s1 + $0x144] ss:$8 sps:$4 sm:$0xff]  }
   0x7   :  { %428 = vmatpush1.bf16.msra.mxu1 %v620_v6  ;;  %v638_v18 = vld [vmem:[%s956_s1 + $0x40] ss:$8 sps:$4 sm:$0xff]   ;;  %v640_v20 = vld [vmem:[%s956_s1 + $0x54] ss:$8 sps:$4 sm:$0xff]   ;;  %v644_v22 = vld [vmem:[%s956_s1 + $0x50] ss:$8 sps:$4 sm:$0xff]  }
   0x8   :  { %469 = vmatpush1.bf16.msra.mxu0 %v621_v7  ;;  %429 = vmatprep.subr.bf16.mxu1 %v622_v8  ;;  %v639_v19 = vld [vmem:[%s956_s1 + $0x140] ss:$8 sps:$4 sm:$0xff]   ;;  %v642_v21 = vld [vmem:[%s956_s1 + $0x154] ss:$8 sps:$4 sm:$0xff]   ;;  %v645_v23 = vld [vmem:[%s956_s1 + $0x150] ss:$8 sps:$4 sm:$0xff]   ;;  %v95_v8 = vlaneseq }
   0x9   :  { %470 = vmatprep.subr.bf16.mxu0 %v624_v9  ;;  %v646_v24 = vld [vmem:[%s956_s1 + $0x64] ss:$8 sps:$4 sm:$0xff]   ;;  %v650_v26 = vld [vmem:[%s956_s1 + $0x60] ss:$8 sps:$4 sm:$0xff]   ;;  %v652_v28 = vld [vmem:[%s956_s1 + $0x74] ss:$8 sps:$4 sm:$0xff]  }
   0xa   :  { %v648_v25 = vld [vmem:[%s956_s1 + $0x164] ss:$8 sps:$4 sm:$0xff]   ;;  %v651_v27 = vld [vmem:[%s956_s1 + $0x160] ss:$8 sps:$4 sm:$0xff]   ;;  %v654_v29 = vld [vmem:[%s956_s1 + $0x174] ss:$8 sps:$4 sm:$0xff]  }
   0xb   :  { %430 = vmatpush1.bf16.msra.mxu1 %v626_v10  ;;  %v656_v30 = vld [vmem:[%s956_s1 + $0x70] ss:$8 sps:$4 sm:$0xff]   ;;  %v658_v32 = vld [vmem:[%s956_s1 + $0x84] ss:$8 sps:$4 sm:$0xff]   ;;  %v662_v34 = vld [vmem:[%s956_s1 + $0x80] ss:$8 sps:$4 sm:$0xff]  }
   0xc   :  { %471 = vmatpush1.bf16.msra.mxu0 %v627_v11  ;;  %431 = vmatprep.subr.bf16.mxu1 %v628_v12  ;;  %v657_v31 = vld [vmem:[%s956_s1 + $0x170] ss:$8 sps:$4 sm:$0xff]   ;;  %v660_v33 = vld [vmem:[%s956_s1 + $0x184] ss:$8 sps:$4 sm:$0xff]   ;;  %v663_v35 = vld [vmem:[%s956_s1 + $0x180] ss:$8 sps:$4 sm:$0xff]  }
   0xd   :  { %472 = vmatprep.subr.bf16.mxu0 %v630_v13  ;;  %v664_v36 = vld [vmem:[%s956_s1 + $0x94] ss:$8 sps:$4 sm:$0xff]   ;;  %v668_v38 = vld [vmem:[%s956_s1 + $0x90] ss:$8 sps:$4 sm:$0xff]   ;;  %v670_v40 = vld [vmem:[%s956_s1 + $0xa4] ss:$8 sps:$4 sm:$0xff]  }
   0xe   :  { %v666_v37 = vld [vmem:[%s956_s1 + $0x194] ss:$8 sps:$4 sm:$0xff]   ;;  %v669_v39 = vld [vmem:[%s956_s1 + $0x190] ss:$8 sps:$4 sm:$0xff]   ;;  %v672_v41 = vld [vmem:[%s956_s1 + $0x1a4] ss:$8 sps:$4 sm:$0xff]  }
   0xf   :  { %432 = vmatpush1.bf16.msra.mxu1 %v632_v14  ;;  %v674_v42 = vld [vmem:[%s956_s1 + $0xa0] ss:$8 sps:$4 sm:$0xff]   ;;  %v676_v44 = vld [vmem:[%s956_s1 + $0xb4] ss:$8 sps:$4 sm:$0xff]   ;;  %v680_v49 = vld [vmem:[%s956_s1 + $0xb0] ss:$8 sps:$4 sm:$0xff]  }
  0x10   :  { %473 = vmatpush1.bf16.msra.mxu0 %v633_v15  ;;  %433 = vmatprep.subr.bf16.mxu1 %v634_v16  ;;  %v675_v43 = vld [vmem:[%s956_s1 + $0x1a0] ss:$8 sps:$4 sm:$0xff]   ;;  %v678_v45 = vld [vmem:[%s956_s1 + $0x1b4] ss:$8 sps:$4 sm:$0xff]   ;;  %v681_v50 = vld [vmem:[%s956_s1 + $0x1b0] ss:$8 sps:$4 sm:$0xff]  }
  0x11   :  { %474 = vmatprep.subr.bf16.mxu0 %v636_v17  ;;  %v22_v46 = vld [vmem:[%s957_s0 + $0x8] sm:$0xff]  ;;  %v24_v48 = vld [vmem:[%s957_s0 + $0x18] sm:$0xff]  ;;  %v21_v4 = vld [vmem:[%s957_s0] sm:$0xff]  ;;  %v96_v9 = vshrl.u32 %v95_v8, 7 }
  0x12   :  { %v26_v47 = vpack.c.bf16 %v22_v46, %v22_v46  ;;  %v28_v51 = vpack.c.bf16 %v24_v48, %v24_v48  ;;  %v682_v52 = vld [vmem:[%s956_s1 + $0xc4] ss:$8 sps:$4 sm:$0xff]   ;;  %v686_v54 = vld [vmem:[%s956_s1 + $0xc0] ss:$8 sps:$4 sm:$0xff]   ;;  %v688_v56 = vld [vmem:[%s956_s1 + $0xd4] ss:$8 sps:$4 sm:$0xff]   ;;  %v25_v6 = vpack.c.bf16 %v21_v4, %v21_v4 }
  0x13   :  { %434 = vmatpush1.bf16.msra.mxu1 %v638_v18  ;;  %v684_v53 = vld [vmem:[%s956_s1 + $0x1c4] ss:$8 sps:$4 sm:$0xff]   ;;  %v687_v55 = vld [vmem:[%s956_s1 + $0x1c0] ss:$8 sps:$4 sm:$0xff]   ;;  %v690_v57 = vld [vmem:[%s956_s1 + $0x1d4] ss:$8 sps:$4 sm:$0xff]  }
  0x14   :  { %475 = vmatpush1.bf16.msra.mxu0 %v639_v19  ;;  %435 = vmatprep.subr.bf16.mxu1 %v640_v20  ;;  %v692_v58 = vld [vmem:[%s956_s1 + $0xd0] ss:$8 sps:$4 sm:$0xff]   ;;  %v694_v60 = vld [vmem:[%s956_s1 + $0xe4] ss:$8 sps:$4 sm:$0xff]   ;;  %v698_v62 = vld [vmem:[%s956_s1 + $0xe0] ss:$8 sps:$4 sm:$0xff]  }
  0x15   :  { %476 = vmatprep.subr.bf16.mxu0 %v642_v21  ;;  %457 = vmatprep.mubr.bf16.mxu1 %v26_v47  ;;  %v693_v59 = vld [vmem:[%s956_s1 + $0x1d0] ss:$8 sps:$4 sm:$0xff]   ;;  %v696_v61 = vld [vmem:[%s956_s1 + $0x1e4] ss:$8 sps:$4 sm:$0xff]   ;;  %v699_v63 = vld [vmem:[%s956_s1 + $0x1e0] ss:$8 sps:$4 sm:$0xff]  }
  0x16   :  { %498 = vmatprep.mubr.bf16.mxu0 %v28_v51  ;;  %v700_v0 = vld [vmem:[%s956_s1 + $0xf4] ss:$8 sps:$4 sm:$0xff]   ;;  %v704_v2 = vld [vmem:[%s956_s1 + $0xf0] ss:$8 sps:$4 sm:$0xff]   ;;  %v97_v10 = vsub.s32 0, %v96_v9  ;;  %v101_v12 = vsub.s32 1, %v96_v9 }
  0x17   :  { %436 = vmatpush1.bf16.msra.mxu1 %v644_v22  ;;  %v702_v1 = vld [vmem:[%s956_s1 + $0x1f4] ss:$8 sps:$4 sm:$0xff]   ;;  %v705_v3 = vld [vmem:[%s956_s1 + $0x1f0] ss:$8 sps:$4 sm:$0xff]   ;;  %v93_v11 = vld [vmem:[%s958_s2] sm:$0x3] }
  0x18   :  { %477 = vmatpush1.bf16.msra.mxu0 %v645_v23  ;;  %437 = vmatprep.subr.bf16.mxu1 %v646_v24  ;;  %v23_v5 = vld [vmem:[%s957_s0 + $0x10] sm:$0xff]  ;;  %v98_v13 = vrot.slane %v93_v11, %v97_v10  ;;  %v102_v14 = vrot.slane %v93_v11, %v101_v12  ;;  %v509_v17 = vld [vmem:[%s959_s3] sm:$0x3] }
  0x19   :  { %478 = vmatprep.subr.bf16.mxu0 %v648_v25  ;;  %v27_v7 = vpack.c.bf16 %v23_v5, %v23_v5 }
  0x1b   :  { %438 = vmatpush1.bf16.msra.mxu1 %v650_v26 }
  0x1c   :  { %479 = vmatpush1.bf16.msra.mxu0 %v651_v27  ;;  %439 = vmatprep.subr.bf16.mxu1 %v652_v28  ;;  %v514_v27 = vrot.slane %v509_v17, %v97_v10 }
  0x1d   :  { %480 = vmatprep.subr.bf16.mxu0 %v654_v29  ;;  %v518_v29 = vrot.slane %v509_v17, %v101_v12 }
  0x1f   :  { %440 = vmatpush1.bf16.msra.mxu1 %v656_v30 }
  0x20   :  { %481 = vmatpush1.bf16.msra.mxu0 %v657_v31  ;;  %441 = vmatprep.subr.bf16.mxu1 %v658_v32 }
  0x21   :  { %482 = vmatprep.subr.bf16.mxu0 %v660_v33 }
  0x23   :  { %442 = vmatpush1.bf16.msra.mxu1 %v662_v34 }
  0x24   :  { %483 = vmatpush1.bf16.msra.mxu0 %v663_v35  ;;  %443 = vmatprep.subr.bf16.mxu1 %v664_v36  ;;  %v527_v35 = vstv %s960_s4 }
  0x25   :  { %484 = vmatprep.subr.bf16.mxu0 %v666_v37 }
  0x27   :  { %444 = vmatpush1.bf16.msra.mxu1 %v668_v38 }
  0x28   :  { %485 = vmatpush1.bf16.msra.mxu0 %v669_v39  ;;  %445 = vmatprep.subr.bf16.mxu1 %v670_v40 }
  0x29   :  { %486 = vmatprep.subr.bf16.mxu0 %v672_v41 }
  0x2b   :  { %446 = vmatpush1.bf16.msra.mxu1 %v674_v42 }
  0x2c   :  { %487 = vmatpush1.bf16.msra.mxu0 %v675_v43  ;;  %447 = vmatprep.subr.bf16.mxu1 %v676_v44 }
  0x2d   :  { %488 = vmatprep.subr.bf16.mxu0 %v678_v45 }
  0x2f   :  { %448 = vmatpush1.bf16.msra.mxu1 %v680_v49 }
  0x30   :  { %489 = vmatpush1.bf16.msra.mxu0 %v681_v50  ;;  %449 = vmatprep.subr.bf16.mxu1 %v682_v52 }
  0x31   :  { %490 = vmatprep.subr.bf16.mxu0 %v684_v53 }
  0x33   :  { %450 = vmatpush1.bf16.msra.mxu1 %v686_v54 }
  0x34   :  { %491 = vmatpush1.bf16.msra.mxu0 %v687_v55  ;;  %451 = vmatprep.subr.bf16.mxu1 %v688_v56 }
  0x35   :  { %492 = vmatprep.subr.bf16.mxu0 %v690_v57 }
  0x37   :  { %452 = vmatpush1.bf16.msra.mxu1 %v692_v58 }
  0x38   :  { %493 = vmatpush1.bf16.msra.mxu0 %v693_v59  ;;  %453 = vmatprep.subr.bf16.mxu1 %v694_v60 }
  0x39   :  { %494 = vmatprep.subr.bf16.mxu0 %v696_v61 }
  0x3b   :  { %454 = vmatpush1.bf16.msra.mxu1 %v698_v62 }
  0x3c   :  { %495 = vmatpush1.bf16.msra.mxu0 %v699_v63  ;;  %455 = vmatprep.subr.bf16.mxu1 %v700_v0 }
  0x3d   :  { %496 = vmatprep.subr.bf16.mxu0 %v702_v1 }
  0x3f   :  { %456 = vmatpush1.bf16.msra.mxu1 %v704_v2 }
  0x40   :  { %497 = vmatpush1.bf16.msra.mxu0 %v705_v3 }
  0x42   :  { %458 = vmatmul.mubr.bf16.vlgmr.msra.gmra.mrb[0].mxu1 %v25_v6 }
  0x43   :  { %499 = vmatmul.mubr.bf16.vlgmr.msra.gmra.mrb[0].mxu0 %v27_v7 }
 0x115   :  { %v459_v15 = vpop.f32.mrb[0].mxu1 }
 0x116   :  { %v500_v16 = vpop.f32.mrb[0].mxu0  ;;  %v460_v18 = vadd.f32 %v459_v15, %v98_v13  ;;  %v461_v19 = vpop.f32.mrb[1].mxu1 }
 0x117   :  { %v502_v20 = vpop.f32.mrb[1].mxu0  ;;  %v462_v21 = vadd.f32 %v461_v19, %v102_v14  ;;  %v463_v22 = vpop.f32.mrb[2].mxu1 }
 0x118   :  { %v504_v23 = vpop.f32.mrb[2].mxu0  ;;  %v501_v24 = vadd.f32 %v500_v16, %v460_v18  ;;  %v464_v25 = vpop.f32.mrb[3].mxu1 }
 0x119   :  { %v505_v26 = vpop.f32.mrb[3].mxu0  ;;  %v503_v28 = vadd.f32 %v502_v20, %v462_v21 }
 0x11a   :  { %v507_v30 = vmax.f32 %v501_v24, 0.0 }
 0x11b   :  { %v508_v31 = vmax.f32 %v503_v28, 0.0 }
 0x11c   :  { %v521_v32 = vmul.f32 %v514_v27, %v507_v30 }
 0x11d   :  { %v522_v33 = vmul.f32 %v518_v29, %v508_v31 }
 0x11f   :  { %v523_v34 = vadd.f32 %v522_v33, %v521_v32 }
 0x121   :  { %524 = vadd.xlane.f32.xlu0 %v523_v34 }
 0x1ae   :  { %v525_v36 = vpop.xlane.xlu0 %524 }
 0x1af   :  { %v528_v37 = vadd.f32 %v527_v35, %v525_v36 }
 0x1b1   :  { %v605_v38 = vmul.f32 -1.442695, %v528_v37 }
 0x1b3   :  { %706 = vpow2.f32 %v605_v38 }
 0x1bd   :  { %v707_v39 = vpop.eup %706 }
 0x1be   :  { %v532_v40 = vadd.f32 1.0, %v707_v39 }
 0x1c0   :  { %708 = vrcp.f32 %v532_v40 }
 0x1ca   :  { %v709_v41 = vpop.eup %708 }
 0x1cb   :  { %536 = vst.msk [vmem:[%s961_s5] sm:$0xff] %vm535_vm0, %v709_v41 }

</bundles_post_ra>
